<compile_context>
chip_gen: v7x
topology: tpu7x:2x2x1
jax: 0.10.0
libtpu: 0.0.40
codegen_flags: <defaults>
</compile_context>

<pallas_src>
import jax
import jax.numpy as jnp
from jax.experimental import pallas as pl
from jax.experimental.pallas import tpu as pltpu

KSIZE = 3
EPS = 1e-5


def _resblock_kernel(x_ref, w1_ref, b1_ref, w2_ref, b2_ref, o_ref):
    """Fused ResBlock for a (B, L, C) channels-last block of samples.

    x_ref : (B, L, C)   input slab (any float dtype)
    w*_ref: (3*C, C)    im2col conv weights (bf16), row blocks = [tap0; tap1; tap2]
    b*_ref: (1, C)      conv bias (f32)
    o_ref : (B, L, C)   output slab
    """
    b, l, c = x_ref.shape
    bl = b * l

    # Flatten samples into the matmul M dimension (layout-preserving: l % 8 == 0
    # or b == 1 at the shapes we emit).
    x2 = x_ref[...].astype(jnp.float32).reshape(bl, c)

    # Per-sample boundary masks for the "same" zero padding, built ONCE per grid
    # step and reused by both convs (VPU work hoisted out of conv3).
    ridx = jax.lax.broadcasted_iota(jnp.int32, (bl, c), 0)
    is_first = (ridx % l) == 0          # row i == 0  within its sample
    is_last = (ridx % l) == (l - 1)     # row i == L-1 within its sample

    def conv3(h2, w_ref, bias_ref):
        # Neighbour taps via XLU roll along the (flattened) length axis.  Rows
        # that wrapped across a sample boundary are exactly the rows the zero
        # padding would have produced, so the mask fixes both wrap and padding.
        h_m1 = jnp.where(is_first, 0.0, pltpu.roll(h2, shift=1, axis=0))       # h[i-1]
        h_p1 = jnp.where(is_last, 0.0, pltpu.roll(h2, shift=bl - 1, axis=0))   # h[i+1]
        # im2col: one MXU matmul, contraction depth 3*C, bf16 operands, f32 acc.
        hcat = jnp.concatenate([h_m1, h2, h_p1], axis=-1).astype(jnp.bfloat16)
        y = jnp.dot(hcat, w_ref[...], preferred_element_type=jnp.float32)
        return y + bias_ref[...].astype(jnp.float32)                           # (1,C) bcast

    def instance_norm(h2):
        # InstanceNorm1d (affine=False): normalize over length per (sample, channel).
        h3 = h2.reshape(b, l, c)
        mean = jnp.mean(h3, axis=1, keepdims=True)
        var = jnp.mean((h3 - mean) ** 2, axis=1, keepdims=True)                # biased
        return ((h3 - mean) * jax.lax.rsqrt(var + EPS)).reshape(bl, c)

    h = conv3(x2, w1_ref, b1_ref)
    h = jnp.maximum(instance_norm(h), 0.0)      # InstanceNorm + ReLU
    h = conv3(h, w2_ref, b2_ref)
    h = instance_norm(h)

    o_ref[...] = (x2 + h).reshape(b, l, c).astype(o_ref.dtype)   # residual add


def _pick_block_batch(n, l):
    """Samples per grid step: fill ~256 MXU M-rows, keep >=2 grid steps (v7x)."""
    target = max(1, 256 // max(l, 1))
    best = 1
    for cand in range(1, n + 1):
        if n % cand != 0 or cand > target:
            continue
        if n >= 2 and (n // cand) < 2:      # keep both v7x TensorCores busy
            continue
        best = cand
    return best


def resblock_forward_nlc(x_nlc, params):
    """Kernel-native forward, channels-last.  x_nlc: (N, L, C) -> (N, L, C).

    Use this entry point when chaining ResBlocks to avoid NCL<->NLC HBM passes.
    """
    w1, b1, w2, b2 = params
    n, l, c = x_nlc.shape
    bb = _pick_block_batch(n, l)

    # (3, Cin, Cout) -> (3*Cin, Cout), pre-cast to bf16 once (halves weight DMA/VMEM).
    w1_m = w1.reshape(KSIZE * c, c).astype(jnp.bfloat16)
    w2_m = w2.reshape(KSIZE * c, c).astype(jnp.bfloat16)

    return pl.pallas_call(
        _resblock_kernel,
        out_shape=jax.ShapeDtypeStruct((n, l, c), x_nlc.dtype),
        grid=(n // bb,),
        in_specs=[
            pl.BlockSpec((bb, l, c), lambda i: (i, 0, 0)),
            pl.BlockSpec((KSIZE * c, c), lambda i: (0, 0)),
            pl.BlockSpec((1, c), lambda i: (0, 0)),
            pl.BlockSpec((KSIZE * c, c), lambda i: (0, 0)),
            pl.BlockSpec((1, c), lambda i: (0, 0)),
        ],
        out_specs=pl.BlockSpec((bb, l, c), lambda i: (i, 0, 0)),
        compiler_params=pltpu.CompilerParams(dimension_semantics=("parallel",)),
    )(x_nlc, w1_m, b1, w2_m, b2)


def resblock_forward(x_ncl, params):
    """PyTorch-semantics forward.  x_ncl: (N, C, L) -> (N, C, L).

    The two transposes here are layout adapters for the NCL spec only; in a
    model built from these blocks keep activations NLC and call
    `resblock_forward_nlc` directly.
    """
    out_nlc = resblock_forward_nlc(jnp.transpose(x_ncl, (0, 2, 1)), params)
    return jnp.transpose(out_nlc, (0, 2, 1))


# ----- parameter construction (deterministic, PyTorch-default-style uniform) -----
def init_params(key, channels):
    k1, k2, k3, k4 = jax.random.split(key, 4)
    bound = 1.0 / jnp.sqrt(channels * KSIZE)
    w1 = jax.random.uniform(k1, (KSIZE, channels, channels), jnp.float32, -bound, bound)
    b1 = jax.random.uniform(k2, (1, channels), jnp.float32, -bound, bound)
    w2 = jax.random.uniform(k3, (KSIZE, channels, channels), jnp.float32, -bound, bound)
    b2 = jax.random.uniform(k4, (1, channels), jnp.float32, -bound, bound)
    return (w1, b1, w2, b2)


# ----- pure-JAX reference (correctness check only, all-f32) -----
def reference_forward(x_ncl, params):
    w1, b1, w2, b2 = params

    def conv(h, w, b):
        wk = jnp.transpose(w, (2, 1, 0))       # (K,Cin,Cout) -> (Cout,Cin,K) = OIW
        y = jax.lax.conv_general_dilated(
            h, wk, window_strides=(1,), padding=[(1, 1)],
            dimension_numbers=("NCH", "OIH", "NCH"))
        return y + b[0][None, :, None]

    def instance_norm(h):
        mean = jnp.mean(h, axis=2, keepdims=True)
        var = jnp.mean((h - mean) ** 2, axis=2, keepdims=True)
        return (h - mean) * jax.lax.rsqrt(var + EPS)

    h = conv(x_ncl, w1, b1)
    h = instance_norm(h)
    h = jnp.maximum(h, 0.0)
    h = conv(h, w2, b2)
    h = instance_norm(h)
    return x_ncl + h


if __name__ == "__main__":
    key = jax.random.PRNGKey(0)
    kx, kp = jax.random.split(key)

    N, C, L = 2, 128, 16                      # (batch, channels, length), NCL
    x = jax.random.normal(kx, (N, C, L), jnp.float32)
    params = init_params(kp, C)

    out = jax.block_until_ready(resblock_forward(x, params))
    ref = jax.block_until_ready(reference_forward(x, params))

    assert out.shape == ref.shape == (N, C, L), out.shape
    max_err = float(jnp.max(jnp.abs(out - ref)))
    # bf16 matmul operands (f32 accumulation, f32 norms/residual) vs. an all-f32
    # lax.conv reference -> loosened tolerance (observed error ~1e-2 worst case).
    assert jnp.allclose(out, ref, rtol=3e-2, atol=3e-2), max_err

    print("KERNEL_OK")
</pallas_src>

<mosaic_0001>
module attributes {stable_mosaic.version = 11 : i64} {
  func.func @_resblock_kernel(%arg0: i32, %arg1: memref<1x16x128xf32, #tpu.memory_space<vmem>>, %arg2: memref<384x128xbf16, #tpu.memory_space<vmem>>, %arg3: memref<1x128xf32, #tpu.memory_space<vmem>>, %arg4: memref<384x128xbf16, #tpu.memory_space<vmem>>, %arg5: memref<1x128xf32, #tpu.memory_space<vmem>>, %arg6: memref<1x16x128xf32, #tpu.memory_space<vmem>>) attributes {dimension_semantics = [#tpu.dimension_semantics<parallel>], iteration_bounds = array<i64: 2>, scalar_prefetch = 0 : i64, scratch_operands = 0 : i64, tpu.core_type = #tpu.core_type<tc>, window_params = [{transform_indices = @transform_0, window_bounds = array<i64: 1, 16, 128>}, {pipeline_mode = #tpu.pipeline_mode<synchronous>, transform_indices = @transform_1, window_bounds = array<i64: 384, 128>}, {pipeline_mode = #tpu.pipeline_mode<synchronous>, transform_indices = @transform_2, window_bounds = array<i64: 1, 128>}, {pipeline_mode = #tpu.pipeline_mode<synchronous>, transform_indices = @transform_3, window_bounds = array<i64: 384, 128>}, {pipeline_mode = #tpu.pipeline_mode<synchronous>, transform_indices = @transform_4, window_bounds = array<i64: 1, 128>}, {transform_indices = @transform_5, window_bounds = array<i64: 1, 16, 128>}]} {
    %c0 = arith.constant 0 : index
    %c0_0 = arith.constant 0 : index
    %c0_1 = arith.constant 0 : index
    %0 = vector.load %arg1[%c0, %c0_0, %c0_1] : memref<1x16x128xf32, #tpu.memory_space<vmem>>, vector<1x16x128xf32>
    %1 = vector.shape_cast %0 : vector<1x16x128xf32> to vector<16x128xf32>
    %2 = tpu.iota {dimensions = array<i32: 0>} : vector<16x128xi32>
    %c16_i32 = arith.constant 16 : i32
    %c0_i32 = arith.constant 0 : i32
    %3 = arith.cmpi eq, %c16_i32, %c0_i32 : i32
    %c1_i32 = arith.constant 1 : i32
    %4 = arith.select %3, %c1_i32, %c16_i32 : i32
    %5 = vector.broadcast %4 : i32 to vector<16x128xi32>
    %6 = arith.remsi %2, %5 : vector<16x128xi32>
    %c0_i32_2 = arith.constant 0 : i32
    %7 = vector.broadcast %c0_i32_2 : i32 to vector<16x128xi32>
    %8 = arith.cmpi ne, %6, %7 : vector<16x128xi32>
    %c0_i32_3 = arith.constant 0 : i32
    %9 = vector.broadcast %c0_i32_3 : i32 to vector<16x128xi32>
    %10 = arith.cmpi slt, %6, %9 : vector<16x128xi32>
    %c0_i32_4 = arith.constant 0 : i32
    %11 = arith.cmpi slt, %4, %c0_i32_4 : i32
    %12 = vector.broadcast %11 : i1 to vector<16x128xi1>
    %13 = vector.broadcast %12 : vector<16x128xi1> to vector<16x128xi1>
    %14 = arith.xori %10, %13 : vector<16x128xi1>
    %15 = arith.andi %14, %8 : vector<16x128xi1>
    %16 = vector.broadcast %4 : i32 to vector<16x128xi32>
    %17 = arith.addi %6, %16 : vector<16x128xi32>
    %18 = arith.select %15, %17, %6 : vector<16x128xi1>, vector<16x128xi32>
    %c0_i32_5 = arith.constant 0 : i32
    %19 = vector.broadcast %c0_i32_5 : i32 to vector<16x128xi32>
    %20 = arith.cmpi eq, %18, %19 : vector<16x128xi32>
    %c16_i32_6 = arith.constant 16 : i32
    %c0_i32_7 = arith.constant 0 : i32
    %21 = arith.cmpi eq, %c16_i32_6, %c0_i32_7 : i32
    %c1_i32_8 = arith.constant 1 : i32
    %22 = arith.select %21, %c1_i32_8, %c16_i32_6 : i32
    %23 = vector.broadcast %22 : i32 to vector<16x128xi32>
    %24 = arith.remsi %2, %23 : vector<16x128xi32>
    %c0_i32_9 = arith.constant 0 : i32
    %25 = vector.broadcast %c0_i32_9 : i32 to vector<16x128xi32>
    %26 = arith.cmpi ne, %24, %25 : vector<16x128xi32>
    %c0_i32_10 = arith.constant 0 : i32
    %27 = vector.broadcast %c0_i32_10 : i32 to vector<16x128xi32>
    %28 = arith.cmpi slt, %24, %27 : vector<16x128xi32>
    %c0_i32_11 = arith.constant 0 : i32
    %29 = arith.cmpi slt, %22, %c0_i32_11 : i32
    %30 = vector.broadcast %29 : i1 to vector<16x128xi1>
    %31 = vector.broadcast %30 : vector<16x128xi1> to vector<16x128xi1>
    %32 = arith.xori %28, %31 : vector<16x128xi1>
    %33 = arith.andi %32, %26 : vector<16x128xi1>
    %34 = vector.broadcast %22 : i32 to vector<16x128xi32>
    %35 = arith.addi %24, %34 : vector<16x128xi32>
    %36 = arith.select %33, %35, %24 : vector<16x128xi1>, vector<16x128xi32>
    %c15_i32 = arith.constant 15 : i32
    %37 = vector.broadcast %c15_i32 : i32 to vector<16x128xi32>
    %38 = arith.cmpi eq, %36, %37 : vector<16x128xi32>
    %c1_i32_12 = arith.constant 1 : i32
    %39 = tpu.dynamic_rotate %1 by %c1_i32_12 dim 0 : vector<16x128xf32>, i32 -> vector<16x128xf32>
    %cst = arith.constant 0.000000e+00 : f32
    %40 = vector.broadcast %cst : f32 to vector<16x128xf32>
    %41 = arith.select %20, %40, %39 : vector<16x128xi1>, vector<16x128xf32>
    %c15_i32_13 = arith.constant 15 : i32
    %42 = tpu.dynamic_rotate %1 by %c15_i32_13 dim 0 : vector<16x128xf32>, i32 -> vector<16x128xf32>
    %cst_14 = arith.constant 0.000000e+00 : f32
    %43 = vector.broadcast %cst_14 : f32 to vector<16x128xf32>
    %44 = arith.select %38, %43, %42 : vector<16x128xi1>, vector<16x128xf32>
    %45 = tpu.concatenate %41, %1, %44 in 1 : vector<16x128xf32>, vector<16x128xf32>, vector<16x128xf32> -> vector<16x384xf32>
    %46 = arith.truncf %45 : vector<16x384xf32> to vector<16x384xbf16>
    %c0_15 = arith.constant 0 : index
    %c0_16 = arith.constant 0 : index
    %47 = vector.load %arg2[%c0_15, %c0_16] : memref<384x128xbf16, #tpu.memory_space<vmem>>, vector<384x128xbf16>
    %cst_17 = arith.constant dense<0.000000e+00> : vector<16x128xf32>
    %48 = tpu.matmul %46, %47, %cst_17 {dimension_numbers = #tpu.dot_dimension_numbers<[1], [0], [0], [1], [0, 0, 1, 1], [], []>} : vector<16x384xbf16>, vector<384x128xbf16>, vector<16x128xf32> -> vector<16x128xf32>
    %c0_18 = arith.constant 0 : index
    %c0_19 = arith.constant 0 : index
    %49 = vector.load %arg3[%c0_18, %c0_19] : memref<1x128xf32, #tpu.memory_space<vmem>>, vector<1x128xf32>
    %50 = vector.broadcast %49 : vector<1x128xf32> to vector<16x128xf32>
    %51 = arith.addf %48, %50 : vector<16x128xf32>
    %52 = vector.shape_cast %51 : vector<16x128xf32> to vector<1x16x128xf32>
    %cst_20 = arith.constant dense<0.000000e+00> : vector<1x128xf32>
    %53 = vector.multi_reduction <add>, %52, %cst_20 [1] : vector<1x16x128xf32> to vector<1x128xf32>
    %54 = vector.shape_cast %53 : vector<1x128xf32> to vector<1x1x128xf32>
    %cst_21 = arith.constant 1.600000e+01 : f32
    %55 = vector.broadcast %cst_21 : f32 to vector<1x1x128xf32>
    %56 = arith.divf %54, %55 : vector<1x1x128xf32>
    %57 = vector.broadcast %56 : vector<1x1x128xf32> to vector<1x16x128xf32>
    %58 = arith.subf %52, %57 : vector<1x16x128xf32>
    %59 = arith.mulf %58, %58 : vector<1x16x128xf32>
    %cst_22 = arith.constant dense<0.000000e+00> : vector<1x128xf32>
    %60 = vector.multi_reduction <add>, %59, %cst_22 [1] : vector<1x16x128xf32> to vector<1x128xf32>
    %61 = vector.shape_cast %60 : vector<1x128xf32> to vector<1x1x128xf32>
    %cst_23 = arith.constant 1.600000e+01 : f32
    %62 = vector.broadcast %cst_23 : f32 to vector<1x1x128xf32>
    %63 = arith.divf %61, %62 : vector<1x1x128xf32>
    %64 = vector.broadcast %56 : vector<1x1x128xf32> to vector<1x16x128xf32>
    %65 = arith.subf %52, %64 : vector<1x16x128xf32>
    %cst_24 = arith.constant 9.99999974E-6 : f32
    %66 = vector.broadcast %cst_24 : f32 to vector<1x1x128xf32>
    %67 = arith.addf %63, %66 : vector<1x1x128xf32>
    %68 = math.rsqrt %67 : vector<1x1x128xf32>
    %69 = vector.broadcast %68 : vector<1x1x128xf32> to vector<1x16x128xf32>
    %70 = arith.mulf %65, %69 : vector<1x16x128xf32>
    %71 = vector.shape_cast %70 : vector<1x16x128xf32> to vector<16x128xf32>
    %cst_25 = arith.constant 0.000000e+00 : f32
    %72 = vector.broadcast %cst_25 : f32 to vector<16x128xf32>
    %73 = arith.maximumf %71, %72 : vector<16x128xf32>
    %c1_i32_26 = arith.constant 1 : i32
    %74 = tpu.dynamic_rotate %73 by %c1_i32_26 dim 0 : vector<16x128xf32>, i32 -> vector<16x128xf32>
    %cst_27 = arith.constant 0.000000e+00 : f32
    %75 = vector.broadcast %cst_27 : f32 to vector<16x128xf32>
    %76 = arith.select %20, %75, %74 : vector<16x128xi1>, vector<16x128xf32>
    %c15_i32_28 = arith.constant 15 : i32
    %77 = tpu.dynamic_rotate %73 by %c15_i32_28 dim 0 : vector<16x128xf32>, i32 -> vector<16x128xf32>
    %cst_29 = arith.constant 0.000000e+00 : f32
    %78 = vector.broadcast %cst_29 : f32 to vector<16x128xf32>
    %79 = arith.select %38, %78, %77 : vector<16x128xi1>, vector<16x128xf32>
    %80 = tpu.concatenate %76, %73, %79 in 1 : vector<16x128xf32>, vector<16x128xf32>, vector<16x128xf32> -> vector<16x384xf32>
    %81 = arith.truncf %80 : vector<16x384xf32> to vector<16x384xbf16>
    %c0_30 = arith.constant 0 : index
    %c0_31 = arith.constant 0 : index
    %82 = vector.load %arg4[%c0_30, %c0_31] : memref<384x128xbf16, #tpu.memory_space<vmem>>, vector<384x128xbf16>
    %cst_32 = arith.constant dense<0.000000e+00> : vector<16x128xf32>
    %83 = tpu.matmul %81, %82, %cst_32 {dimension_numbers = #tpu.dot_dimension_numbers<[1], [0], [0], [1], [0, 0, 1, 1], [], []>} : vector<16x384xbf16>, vector<384x128xbf16>, vector<16x128xf32> -> vector<16x128xf32>
    %c0_33 = arith.constant 0 : index
    %c0_34 = arith.constant 0 : index
    %84 = vector.load %arg5[%c0_33, %c0_34] : memref<1x128xf32, #tpu.memory_space<vmem>>, vector<1x128xf32>
    %85 = vector.broadcast %84 : vector<1x128xf32> to vector<16x128xf32>
    %86 = arith.addf %83, %85 : vector<16x128xf32>
    %87 = vector.shape_cast %86 : vector<16x128xf32> to vector<1x16x128xf32>
    %cst_35 = arith.constant dense<0.000000e+00> : vector<1x128xf32>
    %88 = vector.multi_reduction <add>, %87, %cst_35 [1] : vector<1x16x128xf32> to vector<1x128xf32>
    %89 = vector.shape_cast %88 : vector<1x128xf32> to vector<1x1x128xf32>
    %cst_36 = arith.constant 1.600000e+01 : f32
    %90 = vector.broadcast %cst_36 : f32 to vector<1x1x128xf32>
    %91 = arith.divf %89, %90 : vector<1x1x128xf32>
    %92 = vector.broadcast %91 : vector<1x1x128xf32> to vector<1x16x128xf32>
    %93 = arith.subf %87, %92 : vector<1x16x128xf32>
    %94 = arith.mulf %93, %93 : vector<1x16x128xf32>
    %cst_37 = arith.constant dense<0.000000e+00> : vector<1x128xf32>
    %95 = vector.multi_reduction <add>, %94, %cst_37 [1] : vector<1x16x128xf32> to vector<1x128xf32>
    %96 = vector.shape_cast %95 : vector<1x128xf32> to vector<1x1x128xf32>
    %cst_38 = arith.constant 1.600000e+01 : f32
    %97 = vector.broadcast %cst_38 : f32 to vector<1x1x128xf32>
    %98 = arith.divf %96, %97 : vector<1x1x128xf32>
    %99 = vector.broadcast %91 : vector<1x1x128xf32> to vector<1x16x128xf32>
    %100 = arith.subf %87, %99 : vector<1x16x128xf32>
    %cst_39 = arith.constant 9.99999974E-6 : f32
    %101 = vector.broadcast %cst_39 : f32 to vector<1x1x128xf32>
    %102 = arith.addf %98, %101 : vector<1x1x128xf32>
    %103 = math.rsqrt %102 : vector<1x1x128xf32>
    %104 = vector.broadcast %103 : vector<1x1x128xf32> to vector<1x16x128xf32>
    %105 = arith.mulf %100, %104 : vector<1x16x128xf32>
    %106 = vector.shape_cast %105 : vector<1x16x128xf32> to vector<16x128xf32>
    %107 = arith.addf %1, %106 : vector<16x128xf32>
    %108 = vector.shape_cast %107 : vector<16x128xf32> to vector<1x16x128xf32>
    %c0_40 = arith.constant 0 : index
    %c0_41 = arith.constant 0 : index
    %c0_42 = arith.constant 0 : index
    %109 = vector.load %arg6[%c0_40, %c0_41, %c0_42] : memref<1x16x128xf32, #tpu.memory_space<vmem>>, vector<1x16x128xf32>
    tpu.vector_store %arg6[%c0_40, %c0_41, %c0_42], %108 {strides = array<i32>} : memref<1x16x128xf32, #tpu.memory_space<vmem>>, vector<1x16x128xf32>,
    return
  }
  func.func @transform_0(%arg0: i32) -> (i32, i32, i32) {
    %c0_i32 = arith.constant 0 : i32
    %c0_i32_0 = arith.constant 0 : i32
    %c0_i32_1 = arith.constant 0 : i32
    return %arg0, %c0_i32, %c0_i32_0 : i32, i32, i32
  }
  func.func @transform_1(%arg0: i32) -> (i32, i32) {
    %c0_i32 = arith.constant 0 : i32
    %c0_i32_0 = arith.constant 0 : i32
    %c0_i32_1 = arith.constant 0 : i32
    return %c0_i32, %c0_i32_0 : i32, i32
  }
  func.func @transform_2(%arg0: i32) -> (i32, i32) {
    %c0_i32 = arith.constant 0 : i32
    %c0_i32_0 = arith.constant 0 : i32
    %c0_i32_1 = arith.constant 0 : i32
    return %c0_i32, %c0_i32_0 : i32, i32
  }
  func.func @transform_3(%arg0: i32) -> (i32, i32) {
    %c0_i32 = arith.constant 0 : i32
    %c0_i32_0 = arith.constant 0 : i32
    %c0_i32_1 = arith.constant 0 : i32
    return %c0_i32, %c0_i32_0 : i32, i32
  }
  func.func @transform_4(%arg0: i32) -> (i32, i32) {
    %c0_i32 = arith.constant 0 : i32
    %c0_i32_0 = arith.constant 0 : i32
    %c0_i32_1 = arith.constant 0 : i32
    return %c0_i32, %c0_i32_0 : i32, i32
  }
  func.func @transform_5(%arg0: i32) -> (i32, i32, i32) {
    %c0_i32 = arith.constant 0 : i32
    %c0_i32_0 = arith.constant 0 : i32
    %c0_i32_1 = arith.constant 0 : i32
    return %arg0, %c0_i32, %c0_i32_0 : i32, i32, i32
  }
}

</mosaic_0001>

<bundles_post_ra>
// kernel: tpu_custom_call.1
= control target key start
LH: loop header
LB: loop body
LE: loop exit
PB: predicated region body
PF: predicated region fallthrough
CT: control target
= control target key end

     0   :  { %10 = vsyncpa [#allocation3], 0  ;;  %s1910_s0 = inlined_call_operand.hbm [shape: f32[2,16,128], index: 0, kind: input, shape index: {}]   ;;  %s1911_s1 = inlined_call_operand.hbm [shape: bf16[384,128], index: 1, kind: input, shape index: {}]   ;;  %s1912_s2 = inlined_call_operand.vmem [shape: f32[1,128], index: 2, kind: input, shape index: {}]   ;;  %s1913_s3 = inlined_call_operand.hbm [shape: bf16[384,128], index: 3, kind: input, shape index: {}]   ;;  %s1914_s4 = inlined_call_operand.vmem [shape: f32[1,128], index: 4, kind: input, shape index: {}]   ;;  %s1915_s5 = inlined_call_operand.hbm [shape: f32[2,16,128], index: 5, kind: output, shape index: {}]  }
   0x1   :  { %12 = vsyncpa [#allocation3 + $0x1], 0 }
   0x2   :  { %13 = vsyncpa [#allocation6], 0 }
   0x3   :  { %14 = vsyncpa [#allocation4], 0 }
   0x4   :  { %16 = vsyncpa [#allocation4 + $0x1], 0  ;;  %s1580_s18 = smov 0   ;;  %s1582_s19 = smov 0  }
   0x5   :  { %s1584_s20 = smov 0   ;;  %s1586_s21 = smov 0  }
   0x6 LB: > { %s1601_s22 = sadd.s32 4294967295, %s1535_s21   ;;  %s1061_s23 = sadd.s32 4294967294, %s1535_s21   ;;  %s1535_s21 = sphi %s1586_s21, %s1943_s21   ;;  %s1531_s20 = sphi %s1584_s20, %s1942_s20   ;;  %s1527_s19 = sphi %s1582_s19, %s1941_s19   ;;  %s1523_s18 = sphi %s1580_s18, %s1940_s18  }
   0x7   : > { %p42_p0 = scmp.ne.s32.totalorder %s1527_s19, %s1523_s18  ;;  %p1916_p1 = scmp.eq.s32.totalorder %s1601_s22, 0 }
   0x8   : > { %p156_p3 = scmp.eq.s32.totalorder %s1061_s23, 1  ;;  %p1062_p5 = scmp.ge.s32.totalorder %s1535_s21, 1 }
   0x9   : > { %p1610_p4 = por %p1916_p1, %p42_p0  ;;  %p163_p7 = scmp.lt.s32.totalorder %s1535_s21, 3 }
   0xa   : > { %p1615_p6 = por %p156_p3, %p42_p0  ;;  %s1537_s27 = smov [#allocation5]  }
   0xb   : > { %s1919_s24 = scalar_select %p1610_p4, 1, 0 }
   0xc   : > { %s1920_s25 = scalar_select %p1615_p6, 1, 0 }
   0xd   : > { %p1620_p8 = pnand %p1062_p5, %p163_p7  ;;  %s175_s28 = sshll.u32 %s1537_s27, 4  ;;  %s1624_s28 = int_to_ptr.vmem [resolvable:$true] %s175_s28 }
   0xe   : > { %s1538_s30 = smov [#allocation7]   ;;  %s1379_s9 = scalar_lea.hbm %s1911_s1, 3072 }
   0xf   : > { %p1263_p9 = pneg %p1620_p8  ;;  %s191_s6 = sshll.u32 %s1538_s30, 4  ;;  %s1635_s6 = int_to_ptr.vmem [resolvable:$true] %s191_s6 }
  0x10   : > { %p1380_p12 = scmp.ne.s32.totalorder %s1911_s1, %s1379_s9  ;;  %p1386_p5 = scmp.lt.u32.totalorder %s1379_s9, %s1911_s1 }
  0x11   : > { %p1631_p11 = pnand %p1263_p9, %p1916_p1 }
  0x13   : > { %p1381_p13 = pneg %p1631_p11 }
  0x15   : > { %p1382_p0 = pnand %p1381_p13, %p1380_p12 }
  0x17   : > { %p1383_p3 = pneg %p1382_p0 }
  0x19   : > { %p1388_p7 = pnand %p1386_p5, %p1383_p3 }
  0x1b   : > { %1391 = shalt.err (!%p1388_p7)
}
  0x1c   : > { %s1392_s14 = scalar_lea.vmem %s1624_s28, 3072  ;;  %p1400_p2 = scmp.lt.s32.totalorder %s1624_s28, %s1624_s28 }
  0x1d   : > { %p1393_p9 = scmp.ne.s32.totalorder %s1624_s28, %s1392_s14  ;;  %p1401_p12 = scmp.lt.s32.totalorder %s1392_s14, %s1392_s14 }
  0x1f   : > { %p1395_p10 = pnand %p1393_p9, %p1381_p13  ;;  %p1402_p0 = por %p1401_p12, %p1400_p2 }
  0x21   : > { %p1396_p1 = pneg %p1395_p10 }
  0x23   : > { %p1403_p6 = pnand %p1402_p0, %p1396_p1 }
  0x25   : > { %1406 = shalt.err (!%p1403_p6)
}
  0x26   : > { %s1539_s15 = smov 64   ;;  %s1540_s16 = smov 4  }
  0x27   : > { %1266 = dma.hbm_to_vmem [thread:$0]  (!%p1631_p11), %s1911_s1, 3072, %s1624_s28, [#allocation6], %s1539_s15, %s1539_s15, %s1540_s16  }
  0x28   : > { %s1407_s7 = scalar_lea.hbm %s1913_s3, 3072 }
  0x29   : > { %p1408_p2 = scmp.ne.s32.totalorder %s1913_s3, %s1407_s7  ;;  %p1414_p10 = scmp.lt.u32.totalorder %s1407_s7, %s1913_s3 }
  0x2b   : > { %p1410_p1 = pnand %p1408_p2, %p1381_p13 }
  0x2d   : > { %p1411_p6 = pneg %p1410_p1 }
  0x2f   : > { %p1416_p3 = pnand %p1414_p10, %p1411_p6 }
  0x31   : > { %1419 = shalt.err (!%p1416_p3)
}
  0x32   : > { %s1420_s28 = scalar_lea.vmem %s1635_s6, 3072  ;;  %p1428_p12 = scmp.lt.s32.totalorder %s1635_s6, %s1635_s6 }
  0x33   : > { %p1421_p5 = scmp.ne.s32.totalorder %s1635_s6, %s1420_s28  ;;  %p1429_p0 = scmp.lt.s32.totalorder %s1420_s28, %s1420_s28 }
  0x35   : > { %p1423_p7 = pnand %p1421_p5, %p1381_p13  ;;  %p1430_p2 = por %p1429_p0, %p1428_p12 }
  0x37   : > { %p1424_p9 = pneg %p1423_p7 }
  0x39   : > { %p1431_p1 = pnand %p1430_p2, %p1424_p9 }
  0x3b   : > { %1434 = shalt.err (!%p1431_p1)
}
  0x3c   : > { %1269 = dma.hbm_to_vmem [thread:$0]  (!%p1631_p11), %s1913_s3, 3072, %s1635_s6, [#allocation6], %s1539_s15, %s1539_s15, %s1540_s16  }
  0x3d   : > { %s1690_s14 = sadd.s32 1, %s1535_s21   ;;  %s29_s29 = sadd.s32 1, %s1531_s20 }
  0x3e   : > { %s26_s17 = ssub.s32 %s1535_s21, %s1690_s14  ;;  %p36_p13 = scmp.ne.s32.totalorder %s1531_s20, %s1527_s19 }
  0x3f   : > { %p27_p6 = scmp.eq.s32.totalorder %s26_s17, 0  ;;  %p37_p10 = scmp.eq.s32.totalorder %s1535_s21, 0 }
  0x40   : > { %p1923_p3 = scmp.eq.s32.totalorder %s1601_s22, 1  ;;  %p1280_p7 = scmp.lt.s32.totalorder %s1535_s21, 2 }
  0x41   : > { %s1706_s27 = scalar_select %p27_p6, %s1531_s20, %s29_s29  }
  0x42   : > { %p1700_p5 = por %p1923_p3, %p36_p13  ;;  %p38_p9 = por %p37_p10, %p36_p13 }
  0x43   : > { %s208_s30 = sand.u32 1, %s1531_s20   ;;  %s1145_s6 = sshll.u32 %s1535_s21, 8 }
  0x44   : > { %s1924_s23 = scalar_select %p1700_p5, 1, 0 }
  0x45   : > { %s1066_s7 = sshll.u32 %s208_s30, 4  ;;  %s1713_s8 = scalar_lea.hbm %s1910_s0, %s1145_s6 }
  0x46   : > { %s212_s9 = scalar_lea.vmem [#allocation2], %s1066_s7  ;;  %p1717_p11 = pnand %p1280_p7, %p38_p9 }
  0x47   : > { %s219_s10 = sshll.u32 %s212_s9, 4  ;;  %s1721_s28 = scalar_lea.sflag [#allocation3], %s208_s30  ;;  %s1715_s10 = int_to_ptr.vmem [resolvable:$true] %s219_s10 }
  0x48   : > { %s1435_s12 = scalar_lea.hbm %s1713_s8, 256  ;;  %p1437_p0 = pneg %p1717_p11 }
  0x49   : > { %p1436_p12 = scmp.ne.s32.totalorder %s1713_s8, %s1435_s12  ;;  %s1440_s17 = scalar_lea.hbm %s1910_s0, 512 }
  0x4a   : > { %p1441_p13 = scmp.lt.u32.totalorder %s1713_s8, %s1910_s0  ;;  %p1442_p6 = scmp.lt.u32.totalorder %s1440_s17, %s1435_s12 }
  0x4b   : > { %p1438_p2 = pnand %p1437_p0, %p1436_p12  ;;  %p1444_p3 = scmp.lt.u32.totalorder %s1435_s12, %s1713_s8 }
  0x4c   : > { %p1443_p10 = por %p1442_p6, %p1441_p13 }
  0x4d   : > { %p1439_p1 = pneg %p1438_p2 }
  0x4e   : > { %p1445_p7 = por %p1444_p3, %p1443_p10 }
  0x50   : > { %p1446_p9 = pnand %p1445_p7, %p1439_p1 }
  0x52   : > { %1449 = shalt.err (!%p1446_p9)
}
  0x53   : > { %s1450_s30 = scalar_lea.vmem %s1715_s10, 256  ;;  %s1541_s15 = smov [#allocation2]  }
  0x54   : > { %p1451_p12 = scmp.ne.s32.totalorder %s1715_s10, %s1450_s30  ;;  %s1455_s16 = sshll.u32 %s1541_s15, 4  ;;  %s1456_s16 = int_to_ptr.vmem [resolvable:$false] %s1455_s16 }
  0x55   : > { %s1457_s9 = scalar_lea.vmem %s1456_s16, 512  ;;  %p1458_p4 = scmp.lt.s32.totalorder %s1715_s10, %s1456_s16 }
  0x56   : > { %p1453_p2 = pnand %p1451_p12, %p1437_p0  ;;  %p1459_p13 = scmp.lt.s32.totalorder %s1457_s9, %s1450_s30 }
  0x58   : > { %p1454_p5 = pneg %p1453_p2  ;;  %p1460_p6 = por %p1459_p13, %p1458_p4 }
  0x5a   : > { %p1461_p10 = pnand %p1460_p6, %p1454_p5 }
  0x5c   : > { %1464 = shalt.err (!%p1461_p10)
}
  0x5d   : > { %s1542_s12 = smov 128   ;;  %s1543_s13 = smov 8  }
  0x5e   : > { %1273 = dma.hbm_to_vmem [thread:$0]  (!%p1717_p11), %s1713_s8, 256, %s1715_s10, %s1721_s28, %s1542_s12, %s1542_s12, %s1543_s13  }
  0x5f   : > { %231 = sbr.rel (%p1620_p8) target bundleno = 708 (0x2c4), region = 40  ;;  %s1752_s29 = sand.u32 (!%p1620_p8), 1, %s1527_s19  }
  0x60   : > { %s1070_s17 = sshll.u32 (!%p1620_p8), %s1752_s29, 4  ;;  %s234_s7 = scalar_lea.sflag (!%p1620_p8), [#allocation3], %s1752_s29 }
  0x61   : > { %s1758_s6 = scalar_lea.vmem (!%p1620_p8), [#allocation2], %s1070_s17  ;;  %p1926_p4 = scmp.ne.s32.totalorder (!%p1620_p8), %s1919_s24, 0 }
  0x66   : > { %1510 = dma.done.wait (%p1926_p4), %s234_s7, 256  }
  0x67   : > { %1512 = vsyncadd (%p1926_p4), %s234_s7, 4294967040  ;;  %p1927_p5 = scmp.eq.s32.totalorder %s1601_s22, 0 }
  0x69   : > { %1514 = dma.done.wait (%p1927_p5), [#allocation6], 6144   ;;  %p1928_p8 = pmov %p1927_p5 }
  0x6a   : > { %v1544_v0 = vmov 0.0   ;;  %vm1545_vm0 = vmmov 0   ;;  %v1327_v1 = vld [vmem:[#allocation5 + $0x40] sm:$0xff]   ;;  %v1330_v4 = vld [vmem:[#allocation5 + $0x48] sm:$0xff]   ;;  %v1333_v7 = vld [vmem:[#allocation5 + $0x50] sm:$0xff]   ;;  %v275_v8 = vlaneseq  ;;  %vm1546_vm4 = vmmov 1  }
  0x6b   : > { %1516 = vsyncadd (%p1928_p8), [#allocation6], 4294961152  ;;  %1211 = vmatprep.subr.bf16.mxu1 %v1544_v0  ;;  %1227 = vmatprep.mubr.msk.bf16.mxu1 %vm1545_vm0, %v1544_v0  ;;  %v1328_v2 = vld [vmem:[#allocation5] sm:$0xff]   ;;  %v1331_v5 = vld [vmem:[#allocation5 + $0x8] sm:$0xff]   ;;  %s1146_s11 = sshll.u32 %s1601_s22, 8  ;;  %s271_s28 = scalar_lea.vmem [#allocation8], %s1070_s17 }
  0x6c   : > { %1149 = vmatprep.subr.bf16.mxu0 %v1327_v1  ;;  %v1329_v3 = vld [vmem:[#allocation5 + $0x80] sm:$0xff]   ;;  %v1332_v6 = vld [vmem:[#allocation5 + $0x88] sm:$0xff]   ;;  %v1334_v9 = vld [vmem:[#allocation5 + $0x10] sm:$0xff]   ;;  %v1773_v13 = vshrl.u32 %v275_v8, 7  ;;  %s969_s30 = sshll.u32 %s271_s28, 4  ;;  %s1862_s9 = scalar_lea.hbm %s1915_s5, %s1146_s11  ;;  %s1864_s30 = int_to_ptr.vmem [resolvable:$true] %s969_s30 }
  0x6d   : > { %1150 = vmatpush3.bf16.msra.mxu0 %v1328_v2  ;;  %1212 = vmatpush3.bf16.msra.mxu1 %v1329_v3  ;;  %v1335_v10 = vld [vmem:[#allocation5 + $0x90] sm:$0xff]   ;;  %v1336_v11 = vld [vmem:[#allocation5 + $0x58] sm:$0xff]   ;;  %v1339_v15 = vld [vmem:[#allocation5 + $0x60] sm:$0xff]   ;;  %s956_s22 = scalar_lea.sflag [#allocation4], %s1752_s29  ;;  %s1465_s12 = scalar_lea.vmem %s1864_s30, 256 }
  0x6e   : > { %1151 = vmatprep.subr.bf16.mxu0 %v1330_v4  ;;  %1213 = vmatprep.subr.bf16.mxu1 %v1544_v0  ;;  %v1337_v12 = vld [vmem:[#allocation5 + $0x18] sm:$0xff]   ;;  %v1340_v16 = vld [vmem:[#allocation5 + $0x20] sm:$0xff]   ;;  %v277_v17 = vadd.s32 8, %v1773_v13  ;;  %v1342_v19 = vld [vmem:[#allocation5 + $0x68] sm:$0xff]   ;;  %v282_v20 = vand.u32 15, %v1773_v13  ;;  %vm308_vm3 = vcmp.lt.s32.totalorder %v1773_v13, 1  ;;  %p1466_p11 = scmp.ne.s32.totalorder %s1864_s30, %s1465_s12 }
  0x6f   : > { %v1338_v14 = vld [vmem:[#allocation5 + $0x98] sm:$0xff]   ;;  %v1341_v18 = vld [vmem:[#allocation5 + $0xa0] sm:$0xff]   ;;  %v1343_v21 = vld [vmem:[#allocation5 + $0x28] sm:$0xff]   ;;  %vm315_vm6 = vcmp.lt.s32.totalorder %v1773_v13, 7  ;;  %p1937_p0 = scmp.ne.s32.totalorder %s1924_s23, 0  ;;  %s1547_s13 = smov [#allocation8]  }
  0x70   : > { %v289_v22 = vand.u32 15, %v277_v17  ;;  %v1344_v23 = vld [vmem:[#allocation5 + $0xa8] sm:$0xff]   ;;  %v1345_v24 = vld [vmem:[#allocation5 + $0x70] sm:$0xff]   ;;  %vm1780_vm1 = vcmp.ne.s32.totalorder %v282_v20, 0  ;;  %v1348_v28 = vld [vmem:[#allocation5 + $0x78] sm:$0xff]   ;;  %s1469_s17 = sshll.u32 %s1547_s13, 4  ;;  %s1470_s17 = int_to_ptr.vmem [resolvable:$false] %s1469_s17 }
  0x71   : > { %1152 = vmatpush3.bf16.msra.mxu0 %v1331_v5  ;;  %1214 = vmatpush3.bf16.msra.mxu1 %v1332_v6  ;;  %v1346_v25 = vld [vmem:[#allocation5 + $0x30] sm:$0xff]   ;;  %v1792_v31 = vld [vmem:[%s1758_s6 + $0x8] sm:$0xff]  ;;  %vm1801_vm5 = vmpackc.low %vm1546_vm4, %vm1780_vm1  ;;  %p1467_p1 = pnand %p1466_p11, %p1937_p0  ;;  %s1471_s7 = scalar_lea.vmem %s1470_s17, 512 }
  0x72   : > { %1153 = vmatprep.subr.bf16.mxu0 %v1333_v7  ;;  %1215 = vmatprep.subr.bf16.mxu1 %v1544_v0  ;;  %v1347_v27 = vld [vmem:[#allocation5 + $0xb0] sm:$0xff]   ;;  %vm1784_vm2 = vcmp.ne.s32.totalorder %v289_v22, 15  ;;  %v307_v33 = vrot.slane %v1792_v31, 7  ;;  %v314_v35 = vrot.slane %v1792_v31, 1  ;;  %v1349_v37 = vld [vmem:[#allocation5 + $0x38] sm:$0xff]   ;;  %v1351_v47 = vld [vmem:[#allocation7 + $0x40] sm:$0xff]   ;;  %p1472_p7 = scmp.lt.s32.totalorder %s1864_s30, %s1470_s17  ;;  %p1473_p9 = scmp.lt.s32.totalorder %s1471_s7, %s1465_s12 }
  0x73   : > { %v1789_v30 = vld [vmem:[%s1758_s6] sm:$0xff]  ;;  %vm1811_vm7 = vmpackc.low %vm1784_vm2, %vm1546_vm4  ;;  %v1350_v40 = vld [vmem:[#allocation5 + $0xb8] sm:$0xff]   ;;  %p1468_p3 = pneg %p1467_p1 }
  0x74   : > { %v306_v32 = vrot.slane %v1789_v30, 7  ;;  %v313_v34 = vrot.slane %v1789_v30, 1  ;;  %v321_v38 = vpack.c.bf16 %v1792_v31, %v1789_v30  ;;  %v1352_v48 = vld [vmem:[#allocation7] sm:$0xff]   ;;  %v1354_v50 = vld [vmem:[#allocation7 + $0x48] sm:$0xff]   ;;  %v1357_v53 = vld [vmem:[#allocation7 + $0x50] sm:$0xff]   ;;  %p1474_p12 = por %p1473_p9, %p1472_p7 }
  0x75   : > { %1154 = vmatpush3.bf16.msra.mxu0 %v1334_v9  ;;  %1216 = vmatpush3.bf16.msra.mxu1 %v1335_v10  ;;  %v1353_v49 = vld [vmem:[#allocation7 + $0x80] sm:$0xff]   ;;  %v1355_v51 = vld [vmem:[#allocation7 + $0x8] sm:$0xff]   ;;  %v1358_v54 = vld [vmem:[#allocation7 + $0x10] sm:$0xff]  }
  0x76   : > { %1155 = vmatprep.subr.bf16.mxu0 %v1336_v11  ;;  %1217 = vmatprep.subr.bf16.mxu1 %v1544_v0  ;;  %v309_v41 = vsel %vm308_vm3, %v306_v32, %v307_v33  ;;  %v310_v42 = vsel %vm308_vm3, %v307_v33, %v306_v32  ;;  %v316_v43 = vsel %vm315_vm6, %v313_v34, %v314_v35  ;;  %v1356_v52 = vld [vmem:[#allocation7 + $0x88] sm:$0xff]   ;;  %v1359_v55 = vld [vmem:[#allocation7 + $0x90] sm:$0xff]   ;;  %v1360_v56 = vld [vmem:[#allocation7 + $0x58] sm:$0xff]   ;;  %p1475_p2 = pnand %p1474_p12, %p1468_p3 }
  0x77   : > { %554 = vmatprep.mubr.bf16.mxu0 %v321_v38  ;;  %v317_v44 = vsel %vm315_vm6, %v314_v35, %v313_v34  ;;  %v1101_v45 = vpack.c.bf16 %v309_v41, %v310_v42  ;;  %v1361_v57 = vld [vmem:[#allocation7 + $0x18] sm:$0xff]   ;;  %v1363_v59 = vld [vmem:[#allocation7 + $0x60] sm:$0xff]   ;;  %v1366_v62 = vld [vmem:[#allocation7 + $0x68] sm:$0xff]  }
  0x78   : > { %v1105_v46 = vpack.c.bf16 %v317_v44, %v316_v43  ;;  %v1362_v58 = vld [vmem:[#allocation7 + $0x98] sm:$0xff]   ;;  %v1364_v60 = vld [vmem:[#allocation7 + $0x20] sm:$0xff]   ;;  %v1367_v63 = vld [vmem:[#allocation7 + $0x28] sm:$0xff]  }
  0x79   : > { %1156 = vmatpush3.bf16.msra.mxu0 %v1337_v12  ;;  %1218 = vmatpush3.bf16.msra.mxu1 %v1338_v14  ;;  %v1365_v61 = vld [vmem:[#allocation7 + $0xa0] sm:$0xff]   ;;  %v1368_v1 = vld [vmem:[#allocation7 + $0xa8] sm:$0xff]   ;;  %v1369_v2 = vld [vmem:[#allocation7 + $0x70] sm:$0xff]  }
  0x7a   : > { %1157 = vmatprep.subr.bf16.mxu0 %v1339_v15  ;;  %1219 = vmatprep.subr.bf16.mxu1 %v1544_v0  ;;  %v1370_v3 = vld [vmem:[#allocation7 + $0x30] sm:$0xff]   ;;  %v1372_v5 = vld [vmem:[#allocation7 + $0x78] sm:$0xff]   ;;  %v1074_v10 = vld [vmem:[%s1912_s2] ss:$0 sm:$0xff] }
  0x7b   : > { %v1371_v4 = vld [vmem:[#allocation7 + $0xb0] sm:$0xff]   ;;  %v1373_v6 = vld [vmem:[#allocation7 + $0x38] sm:$0xff]  }
  0x7c   : > { %v1374_v7 = vld [vmem:[#allocation7 + $0xb8] sm:$0xff]  }
  0x7d   : > { %1158 = vmatpush3.bf16.msra.mxu0 %v1340_v16  ;;  %1220 = vmatpush3.bf16.msra.mxu1 %v1341_v18 }
  0x7e   : > { %1159 = vmatprep.subr.bf16.mxu0 %v1342_v19  ;;  %1221 = vmatprep.subr.bf16.mxu1 %v1544_v0 }
  0x81   : > { %1160 = vmatpush3.bf16.msra.mxu0 %v1343_v21  ;;  %1222 = vmatpush3.bf16.msra.mxu1 %v1344_v23 }
  0x82   : > { %1161 = vmatprep.subr.bf16.mxu0 %v1345_v24  ;;  %1223 = vmatprep.subr.bf16.mxu1 %v1544_v0 }
  0x85   : > { %1162 = vmatpush3.bf16.msra.mxu0 %v1346_v25  ;;  %1224 = vmatpush3.bf16.msra.mxu1 %v1347_v27 }
  0x86   : > { %1163 = vmatprep.subr.bf16.mxu0 %v1348_v28  ;;  %1225 = vmatprep.subr.bf16.mxu1 %v1544_v0 }
  0x89   : > { %1164 = vmatpush3.bf16.msra.mxu0 %v1349_v37  ;;  %1226 = vmatpush3.bf16.msra.mxu1 %v1350_v40 }
  0x8a   : > { %1231 = vmatprep.subr.bf16.mxu1 %v1544_v0  ;;  %1180 = vmatprep.subr.bf16.mxu0 %v1351_v47 }
  0x8c   : > { %1102 = vmatmul.mubr.msk.bf16.vlgmr.msra.gmra.mrb[0].mxu0 %vm1801_vm5, %v1101_v45  ;;  %1228 = vmatmul.mubr.msk.bf16.vlgmr.msra.gmra.mrb[0].mxu1 %vm1811_vm7, %v1105_v46 }
  0x8d   : > { %1247 = vmatprep.mubr.msk.bf16.mxu1 %vm1545_vm0, %v1544_v0  ;;  %1181 = vmatpush3.bf16.msra.mxu0 %v1352_v48 }
  0x8e   : > { %1232 = vmatpush3.bf16.msra.mxu1 %v1353_v49  ;;  %1182 = vmatprep.subr.bf16.mxu0 %v1354_v50 }
  0x8f   : > { %1233 = vmatprep.subr.bf16.mxu1 %v1544_v0 }
  0x91   : > { %1183 = vmatpush3.bf16.msra.mxu0 %v1355_v51 }
  0x92   : > { %1234 = vmatpush3.bf16.msra.mxu1 %v1356_v52  ;;  %1184 = vmatprep.subr.bf16.mxu0 %v1357_v53 }
  0x93   : > { %1235 = vmatprep.subr.bf16.mxu1 %v1544_v0 }
  0x95   : > { %1185 = vmatpush3.bf16.msra.mxu0 %v1358_v54 }
  0x96   : > { %1236 = vmatpush3.bf16.msra.mxu1 %v1359_v55  ;;  %1186 = vmatprep.subr.bf16.mxu0 %v1360_v56 }
  0x97   : > { %1237 = vmatprep.subr.bf16.mxu1 %v1544_v0 }
  0x99   : > { %1187 = vmatpush3.bf16.msra.mxu0 %v1361_v57 }
  0x9a   : > { %1238 = vmatpush3.bf16.msra.mxu1 %v1362_v58  ;;  %1188 = vmatprep.subr.bf16.mxu0 %v1363_v59 }
  0x9b   : > { %1239 = vmatprep.subr.bf16.mxu1 %v1544_v0 }
  0x9d   : > { %1189 = vmatpush3.bf16.msra.mxu0 %v1364_v60 }
  0x9e   : > { %1240 = vmatpush3.bf16.msra.mxu1 %v1365_v61  ;;  %1190 = vmatprep.subr.bf16.mxu0 %v1366_v62 }
  0x9f   : > { %1241 = vmatprep.subr.bf16.mxu1 %v1544_v0 }
  0xa1   : > { %1191 = vmatpush3.bf16.msra.mxu0 %v1367_v63 }
  0xa2   : > { %1242 = vmatpush3.bf16.msra.mxu1 %v1368_v1  ;;  %1192 = vmatprep.subr.bf16.mxu0 %v1369_v2 }
  0xa3   : > { %1243 = vmatprep.subr.bf16.mxu1 %v1544_v0 }
  0xa5   : > { %1193 = vmatpush3.bf16.msra.mxu0 %v1370_v3  ;;  %v1107_v3 = vld [vmem:[%s1914_s4] ss:$0 sm:$0xff] }
  0xa6   : > { %1244 = vmatpush3.bf16.msra.mxu1 %v1371_v4  ;;  %1194 = vmatprep.subr.bf16.mxu0 %v1372_v5 }
  0xa7   : > { %1245 = vmatprep.subr.bf16.mxu1 %v1544_v0 }
  0xa9   : > { %1195 = vmatpush3.bf16.msra.mxu0 %v1373_v6 }
  0xaa   : > { %1246 = vmatpush3.bf16.msra.mxu1 %v1374_v7 }
 0x15f   : > { %v1165_v8 = vpop.f32.mrb[0].mxu0  ;;  %v597_v11 = vpop.f32.mrb[0].mxu1 }
 0x160   : > { %v1166_v9 = vpop.f32.mrb[1].mxu0  ;;  %v1229_v15 = vpop.f32.mrb[1].mxu1 }
 0x161   : > { %v1167_v12 = vadd.f32 %v1166_v9, %v1165_v8  ;;  %v1168_v14 = vpop.f32.mrb[2].mxu0  ;;  %v600_v17 = vpop.f32.mrb[2].mxu1 }
 0x162   : > { %v1169_v16 = vpop.f32.mrb[3].mxu0  ;;  %v1230_v0 = vpop.f32.mrb[3].mxu1 }
 0x163   : > { %v557_v18 = vadd.f32 %v1167_v12, %v1074_v10  ;;  %v1170_v19 = vadd.f32 %v1169_v16, %v1168_v14 }
 0x165   : > { %v598_v20 = vadd.f32 %v597_v11, %v557_v18  ;;  %v560_v21 = vadd.f32 %v1170_v19, %v1074_v10 }
 0x167   : > { %v601_v22 = vadd.f32 %v600_v17, %v560_v21 }
 0x169   : > { %v604_v23 = vadd.f32 %v601_v22, %v598_v20 }
 0x16b   : > { %v605_v24 = vrot.slane %v604_v23, 4 }
 0x16d   : > { %v606_v25 = vadd.f32 %v605_v24, %v604_v23 }
 0x16f   : > { %v607_v26 = vrot.slane %v606_v25, 2 }
 0x171   : > { %v608_v27 = vadd.f32 %v607_v26, %v606_v25 }
 0x173   : > { %v609_v28 = vrot.slane %v608_v27, 1 }
 0x175   : > { %v610_v29 = vadd.f32 %v609_v28, %v608_v27 }
 0x177   : > { %v612_v32 = vmul.f32 0.0625, %v610_v29 }
 0x179   : > { %v613_v33 = vsub.f32 %v598_v20, %v612_v32  ;;  %v614_v34 = vsub.f32 %v601_v22, %v612_v32 }
 0x17b   : > { %v615_v35 = vmul.f32 %v613_v33, %v613_v33  ;;  %v616_v37 = vmul.f32 %v614_v34, %v614_v34 }
 0x17d   : > { %v617_v38 = vadd.f32 %v616_v37, %v615_v35 }
 0x17f   : > { %v618_v40 = vrot.slane %v617_v38, 4 }
 0x181   : > { %v619_v41 = vadd.f32 %v618_v40, %v617_v38 }
 0x183   : > { %v620_v42 = vrot.slane %v619_v41, 2 }
 0x185   : > { %v621_v43 = vadd.f32 %v620_v42, %v619_v41 }
 0x187   : > { %v622_v44 = vrot.slane %v621_v43, 1 }
 0x189   : > { %v623_v45 = vadd.f32 %v622_v44, %v621_v43 }
 0x18b   : > { %v624_v46 = vmul.f32 0.0625, %v623_v45 }
 0x18d   : > { %v625_v47 = vadd.f32 1e-05, %v624_v46 }
 0x18f   : > { %1375 = vrsqrt.f32 %v625_v47 }
 0x199   : > { %v1376_v48 = vpop.eup %1375 }
 0x19a   : > { %v627_v49 = vmul.f32 %v1376_v48, %v613_v33  ;;  %v628_v50 = vmul.f32 %v1376_v48, %v614_v34 }
 0x19c   : > { %v630_v51 = vmax.f32 %v628_v50, 0.0  ;;  %v629_v52 = vmax.f32 %v627_v49, 0.0 }
 0x19e   : > { %v632_v53 = vrot.slane %v630_v51, 7  ;;  %v638_v54 = vrot.slane %v630_v51, 1  ;;  %v631_v55 = vrot.slane %v629_v52, 7  ;;  %v637_v56 = vrot.slane %v629_v52, 1 }
 0x19f   : > { %v644_v57 = vpack.c.bf16 %v630_v51, %v629_v52 }
 0x1a0   : > { %v633_v58 = vsel %vm308_vm3, %v631_v55, %v632_v53  ;;  %v634_v59 = vsel %vm308_vm3, %v632_v53, %v631_v55  ;;  %v639_v60 = vsel %vm315_vm6, %v637_v56, %v638_v54  ;;  %v640_v61 = vsel %vm315_vm6, %v638_v54, %v637_v56 }
 0x1a1   : > { %877 = vmatprep.mubr.bf16.mxu0 %v644_v57  ;;  %v1134_v62 = vpack.c.bf16 %v633_v58, %v634_v59  ;;  %v1138_v63 = vpack.c.bf16 %v640_v61, %v639_v60 }
 0x1a3   : > { %1135 = vmatmul.mubr.msk.bf16.vlgmr.msra.gmra.mrb[4].mxu0 %vm1801_vm5, %v1134_v62  ;;  %1248 = vmatmul.mubr.msk.bf16.vlgmr.msra.gmra.mrb[4].mxu1 %vm1811_vm7, %v1138_v63 }
 0x276   : > { %v1196_v1 = vpop.f32.mrb[4].mxu0  ;;  %v920_v2 = vpop.f32.mrb[4].mxu1 }
 0x277   : > { %v1197_v4 = vpop.f32.mrb[5].mxu0  ;;  %v1249_v5 = vpop.f32.mrb[5].mxu1 }
 0x278   : > { %v1198_v6 = vadd.f32 %v1197_v4, %v1196_v1  ;;  %v1199_v13 = vpop.f32.mrb[6].mxu0  ;;  %v923_v7 = vpop.f32.mrb[6].mxu1 }
 0x279   : > { %v1200_v8 = vpop.f32.mrb[7].mxu0  ;;  %v1250_v9 = vpop.f32.mrb[7].mxu1 }
 0x27a   : > { %v880_v10 = vadd.f32 %v1198_v6, %v1107_v3  ;;  %v1201_v11 = vadd.f32 %v1200_v8, %v1199_v13 }
 0x27c   : > { %v921_v36 = vadd.f32 %v920_v2, %v880_v10  ;;  %v883_v12 = vadd.f32 %v1201_v11, %v1107_v3 }
 0x27e   : > { %v924_v14 = vadd.f32 %v923_v7, %v883_v12 }
 0x280   : > { %v927_v39 = vadd.f32 %v924_v14, %v921_v36 }
 0x282   : > { %v928_v15 = vrot.slane %v927_v39, 4 }
 0x284   : > { %v929_v16 = vadd.f32 %v928_v15, %v927_v39 }
 0x286   : > { %v930_v17 = vrot.slane %v929_v16, 2 }
 0x288   : > { %v931_v18 = vadd.f32 %v930_v17, %v929_v16 }
 0x28a   : > { %v932_v19 = vrot.slane %v931_v18, 1 }
 0x28c   : > { %v933_v0 = vadd.f32 %v932_v19, %v931_v18 }
 0x28e   : > { %v934_v20 = vmul.f32 0.0625, %v933_v0 }
 0x290   : > { %v935_v21 = vsub.f32 %v921_v36, %v934_v20  ;;  %v936_v22 = vsub.f32 %v924_v14, %v934_v20 }
 0x292   : > { %v937_v23 = vmul.f32 %v935_v21, %v935_v21  ;;  %v938_v24 = vmul.f32 %v936_v22, %v936_v22 }
 0x294   : > { %v939_v25 = vadd.f32 %v938_v24, %v937_v23 }
 0x296   : > { %v940_v26 = vrot.slane %v939_v25, 4 }
 0x298   : > { %v941_v27 = vadd.f32 %v940_v26, %v939_v25 }
 0x29a   : > { %v942_v28 = vrot.slane %v941_v27, 2 }
 0x29c   : > { %v943_v29 = vadd.f32 %v942_v28, %v941_v27 }
 0x29e   : > { %v944_v32 = vrot.slane %v943_v29, 1 }
 0x2a0   : > { %v945_v33 = vadd.f32 %v944_v32, %v943_v29 }
 0x2a2   : > { %v946_v34 = vmul.f32 0.0625, %v945_v33 }
 0x2a4   : > { %v947_v35 = vadd.f32 1e-05, %v946_v34 }
 0x2a6   : > { %1377 = vrsqrt.f32 %v947_v35 }
 0x2b0   : > { %v1378_v37 = vpop.eup %1377 }
 0x2b1   : > { %v949_v38 = vmul.f32 %v1378_v37, %v935_v21  ;;  %v950_v40 = vmul.f32 %v1378_v37, %v936_v22 }
 0x2b3   : > { %v951_v41 = vadd.f32 %v949_v38, %v1789_v30  ;;  %v952_v42 = vadd.f32 %v950_v40, %v1792_v31 }
 0x2b5   : > { %954 = vst [vmem:[%s271_s28 + $0x8] sm:$0xff] %v952_v42  ;;  %953 = vst [vmem:[%s271_s28] sm:$0xff] %v951_v41 }
 0x2b6   : > { %1478 = shalt.err (!%p1475_p2)
}
 0x2b7   : > { %s1479_s6 = scalar_lea.hbm %s1862_s9, 256  ;;  %s1483_s8 = scalar_lea.hbm %s1915_s5, 512 }
 0x2b8   : > { %p1480_p13 = scmp.ne.s32.totalorder %s1862_s9, %s1479_s6  ;;  %p1484_p4 = scmp.lt.u32.totalorder %s1862_s9, %s1915_s5 }
 0x2b9   : > { %p1485_p5 = scmp.lt.u32.totalorder %s1483_s8, %s1479_s6  ;;  %p1487_p11 = scmp.lt.u32.totalorder %s1479_s6, %s1862_s9 }
 0x2ba   : > { %p1481_p6 = pnand %p1480_p13, %p1937_p0 }
 0x2bb   : > { %p1486_p8 = por %p1485_p5, %p1484_p4 }
 0x2bc   : > { %p1482_p10 = pneg %p1481_p6 }
 0x2bd   : > { %p1488_p1 = por %p1487_p11, %p1486_p8 }
 0x2bf   : > { %p1489_p3 = pnand %p1488_p1, %p1482_p10 }
 0x2c1   : > { %1492 = shalt.err (!%p1489_p3)
}
 0x2c2   : > { %s1548_s28 = smov 128   ;;  %s1549_s15 = smov 8  }
 0x2c3   : > { %1261 = dma.vmem_to_hbm [thread:$0]  (%p1937_p0), %s1864_s30, 256, %s1862_s9, %s956_s22, %s1548_s28, %s1548_s28, %s1549_s15  }
 0x2c4 PF: > { %s984_s16 = sand.u32 1, %s1523_s18   ;;  %p1938_p7 = scmp.ne.s32.totalorder %s1920_s25, 0 }
 0x2c5   : > { %p1939_p9 = scmp.ge.s32.totalorder %s1535_s21, 2  ;;  %s985_s12 = scalar_lea.sflag [#allocation4], %s984_s16 }
 0x2c7   : > { %p1275_p12 = pnand %p1939_p9, %p1938_p7 }
 0x2c9   : > { %1518 = dma.done.wait (!%p1275_p12), %s985_s12, 256  }
 0x2ca   : > { %1520 = vsyncadd (!%p1275_p12), %s985_s12, 4294967040  ;;  %p19_p2 = scmp.ge.s32.totalorder %s1690_s14, 4   ;;  %s1940_s18 = smov %s1527_s19 }
 0x2cb   : > { %s1941_s19 = smov %s1531_s20  ;;  %s1942_s20 = smov %s1706_s27 }
 0x2cc   : > { %s1943_s21 = smov %s1690_s14  ;;  %21 = sbr.rel (!%p19_p2) target bundleno = 6 (0x6), region = 93 }
 0x2d3   :  { %990 = vsyncpa [#allocation3], 1 }
 0x2d4   :  { %992 = vsyncpa [#allocation3 + $0x1], 1 }
 0x2d5   :  { %993 = vsyncpa [#allocation6], 1 }
 0x2d6   :  { %994 = vsyncpa [#allocation4], 1 }
 0x2d7   :  { %996 = vsyncpa [#allocation4 + $0x1], 1 }

</bundles_post_ra>
